<compile_context>
chip_gen: v5e
topology: v5e:2x2
jax: 0.10.0
libtpu: 0.0.40
codegen_flags: <defaults>
</compile_context>

<pallas_src>
import functools

import jax
import jax.numpy as jnp
from jax.experimental import pallas as pl
from jax.experimental.pallas import tpu as pltpu

BLOCK_SIZE = 8      # block_size in the torch script
N_EMBED = 32        # n_embed
VOCAB_SIZE = 65     # synthetic vocab (e.g. tiny-shakespeare char set size)
LANE = 128


def _round_up(x, m):
    return (x + m - 1) // m * m


def _compute_logits(idx_ref, tok_tab_ref, pos_tab_ref, w_ref, b_ref, *, B, T):
    """logits = lm_head(tok_emb[idx] + pos_emb[arange(T)]), padded vocab."""
    BT = B * T
    Vp = tok_tab_ref.shape[0]          # padded vocab (lane-dense, 128)

    # Token embedding lookup as an exact one-hot matmul on the MXU
    # (one nonzero per row -> bit-exact gather).  Width Vp keeps the
    # intermediate lane-dense and the MXU K dim aligned.
    vocab_iota = jax.lax.broadcasted_iota(jnp.int32, (BT, Vp), 1)
    tok_onehot = (vocab_iota == idx_ref[...]).astype(jnp.float32)
    tok_emb = jnp.dot(tok_onehot, tok_tab_ref[...],
                      preferred_element_type=jnp.float32)         # (BT, E)

    # Positional embedding: flattened row r has position r % T, which is just
    # pos_tab[:T] tiled B times -> sublane concat + add (no matmul).
    pos = pos_tab_ref[0:T, :]                                      # (T, E)
    pos_tiled = jnp.concatenate([pos] * B, axis=0)                 # (BT, E)
    x = tok_emb + pos_tiled

    logits = jnp.dot(x, w_ref[...],
                     preferred_element_type=jnp.float32) + b_ref[...]
    return logits                                                  # (BT, Vp)


def _fwd_kernel(idx_ref, tok_tab_ref, pos_tab_ref, w_ref, b_ref,
                logits_ref, *, B, T):
    logits_ref[...] = _compute_logits(idx_ref, tok_tab_ref, pos_tab_ref,
                                      w_ref, b_ref, B=B, T=T)


def _fwd_loss_kernel(idx_ref, tgt_ref, tok_tab_ref, pos_tab_ref, w_ref, b_ref,
                     logits_ref, loss_ref, *, B, T, V):
    """Fused logits + mean softmax cross-entropy (F.cross_entropy)."""
    logits = _compute_logits(idx_ref, tok_tab_ref, pos_tab_ref,
                             w_ref, b_ref, B=B, T=T)
    logits_ref[...] = logits

    BT, Vp = logits.shape
    lane_iota = jax.lax.broadcasted_iota(jnp.int32, (BT, Vp), 1)
    valid = lane_iota < V                       # mask padded vocab columns
    masked = jnp.where(valid, logits, jnp.float32(-1e30))
    m = jnp.max(masked, axis=-1, keepdims=True)
    sumexp = jnp.sum(jnp.exp(masked - m), axis=-1, keepdims=True)
    lse = m + jnp.log(sumexp)
    # targets are always < V, so the one-hot never touches padded columns
    # (and padded logits are exactly 0 from the zero weight/bias pad).
    onehot = (lane_iota == tgt_ref[...]).astype(jnp.float32)
    picked = jnp.sum(onehot * logits, axis=-1, keepdims=True)
    loss_ref[0, 0] = jnp.mean(lse - picked)


def bigram_forward(idx, params, targets=None):
    """JAX wrapper reproducing BigramLanguageModel.forward semantics."""
    B, T = idx.shape
    BT = B * T
    tok_tab = params["tok_tab"]                  # (V, E)
    pos_tab = params["pos_tab"]                  # (block_size, E)
    V, E = tok_tab.shape
    Vp = _round_up(V, LANE)

    # Lane-dense zero padding of the vocab axis (sliced off / masked later).
    tok_pad = jnp.zeros((Vp, E), jnp.float32).at[:V].set(tok_tab)
    w_pad = jnp.zeros((E, Vp), jnp.float32).at[:, :V].set(params["lm_w"].T)
    b_pad = jnp.zeros((1, Vp), jnp.float32).at[:, :V].set(
        params["lm_b"].reshape(1, -1))

    idx_flat = idx.reshape(BT, 1).astype(jnp.int32)
    vmem = pl.BlockSpec(memory_space=pltpu.MemorySpace.VMEM)

    if targets is None:
        logits_pad = pl.pallas_call(
            functools.partial(_fwd_kernel, B=B, T=T),
            out_shape=jax.ShapeDtypeStruct((BT, Vp), jnp.float32),
            in_specs=[vmem] * 5,
            out_specs=vmem,
        )(idx_flat, tok_pad, pos_tab, w_pad, b_pad)
        return logits_pad[:, :V].reshape(B, T, V), None

    tgt_flat = targets.reshape(BT, 1).astype(jnp.int32)
    logits_pad, loss = pl.pallas_call(
        functools.partial(_fwd_loss_kernel, B=B, T=T, V=V),
        out_shape=(jax.ShapeDtypeStruct((BT, Vp), jnp.float32),
                   jax.ShapeDtypeStruct((1, 1), jnp.float32)),
        in_specs=[vmem] * 6,
        out_specs=(vmem, vmem),
    )(idx_flat, tgt_flat, tok_pad, pos_tab, w_pad, b_pad)
    # Torch returns the flattened (B*T, V) logits view when targets are given.
    return logits_pad[:, :V], loss[0, 0]


def init_params(key):
    """Deterministic parameter init matching the module's shapes."""
    k1, k2, k3, k4 = jax.random.split(key, 4)
    # nn.Embedding default: N(0, 1)
    tok_tab = jax.random.normal(k1, (VOCAB_SIZE, N_EMBED), jnp.float32)
    pos_tab = jax.random.normal(k2, (BLOCK_SIZE, N_EMBED), jnp.float32)
    # nn.Linear default: U(-1/sqrt(fan_in), 1/sqrt(fan_in))
    bound = 1.0 / jnp.sqrt(jnp.float32(N_EMBED))
    lm_w = jax.random.uniform(k3, (VOCAB_SIZE, N_EMBED), jnp.float32,
                              -bound, bound)
    lm_b = jax.random.uniform(k4, (VOCAB_SIZE,), jnp.float32, -bound, bound)
    return {"tok_tab": tok_tab, "pos_tab": pos_tab, "lm_w": lm_w, "lm_b": lm_b}


def _ref_forward(idx, params, targets):
    """Pure-JAX reference for the correctness check."""
    tok = params["tok_tab"][idx]                                # (B, T, E)
    pos = params["pos_tab"][: idx.shape[1]]                     # (T, E)
    x = tok + pos[None]
    logits = jnp.einsum("bte,ve->btv", x, params["lm_w"],
                        precision=jax.lax.Precision.HIGHEST) + params["lm_b"]
    lf = logits.reshape(-1, logits.shape[-1])
    tf = targets.reshape(-1)
    lse = jax.nn.logsumexp(lf, axis=-1)
    loss = jnp.mean(lse - lf[jnp.arange(lf.shape[0]), tf])
    return logits, loss


if __name__ == "__main__":
    key = jax.random.PRNGKey(0)
    pkey, ikey, tkey = jax.random.split(key, 3)

    params = init_params(pkey)

    B, T = 2, BLOCK_SIZE
    idx = jax.random.randint(ikey, (B, T), 0, VOCAB_SIZE, dtype=jnp.int32)
    targets = jax.random.randint(tkey, (B, T), 0, VOCAB_SIZE, dtype=jnp.int32)

    # forward without targets -> ((B, T, V) logits, None)
    logits, loss_none = bigram_forward(idx, params, targets=None)
    jax.block_until_ready(logits)
    assert logits.shape == (B, T, VOCAB_SIZE) and loss_none is None

    # forward with targets -> ((B*T, V) logits, scalar loss)
    logits2, loss = bigram_forward(idx, params, targets=targets)
    jax.block_until_ready((logits2, loss))
    assert logits2.shape == (B * T, VOCAB_SIZE) and loss.shape == ()

    # correctness vs. pure-JAX reference (loose tol for MXU f32 emulation)
    ref_logits, ref_loss = _ref_forward(idx, params, targets)
    assert bool(jnp.allclose(logits2, ref_logits.reshape(B * T, VOCAB_SIZE),
                             atol=5e-2, rtol=5e-2))
    assert bool(jnp.allclose(loss, ref_loss, atol=5e-2, rtol=5e-2))

    print("KERNEL_OK")
</pallas_src>

<mosaic_0001>
module attributes {stable_mosaic.version = 11 : i64} {
  func.func @_fwd_kernel(%arg0: memref<16x1xi32, #tpu.memory_space<vmem>>, %arg1: memref<128x32xf32, #tpu.memory_space<vmem>>, %arg2: memref<8x32xf32, #tpu.memory_space<vmem>>, %arg3: memref<32x128xf32, #tpu.memory_space<vmem>>, %arg4: memref<1x128xf32, #tpu.memory_space<vmem>>, %arg5: memref<16x128xf32, #tpu.memory_space<vmem>>) attributes {dimension_semantics = [], scalar_prefetch = 0 : i64, scratch_operands = 0 : i64, tpu.core_type = #tpu.core_type<tc>} {
    %0 = tpu.iota {dimensions = array<i32: 1>} : vector<16x128xi32>
    %c0 = arith.constant 0 : index
    %c0_0 = arith.constant 0 : index
    %1 = vector.load %arg0[%c0, %c0_0] : memref<16x1xi32, #tpu.memory_space<vmem>>, vector<16x1xi32>
    %2 = vector.broadcast %1 : vector<16x1xi32> to vector<16x128xi32>
    %3 = arith.cmpi eq, %0, %2 : vector<16x128xi32>
    %4 = arith.extui %3 : vector<16x128xi1> to vector<16x128xi32>
    %5 = arith.sitofp %4 : vector<16x128xi32> to vector<16x128xf32>
    %c0_1 = arith.constant 0 : index
    %c0_2 = arith.constant 0 : index
    %6 = vector.load %arg1[%c0_1, %c0_2] : memref<128x32xf32, #tpu.memory_space<vmem>>, vector<128x32xf32>
    %cst = arith.constant dense<0.000000e+00> : vector<16x32xf32>
    %7 = tpu.matmul %5, %6, %cst {dimension_numbers = #tpu.dot_dimension_numbers<[1], [0], [0], [1], [0, 0, 1, 1], [], []>} : vector<16x128xf32>, vector<128x32xf32>, vector<16x32xf32> -> vector<16x32xf32>
    %c0_3 = arith.constant 0 : index
    %c0_4 = arith.constant 0 : index
    %8 = vector.load %arg2[%c0_3, %c0_4] : memref<8x32xf32, #tpu.memory_space<vmem>>, vector<8x32xf32>
    %9 = tpu.concatenate %8, %8 in 0 : vector<8x32xf32>, vector<8x32xf32> -> vector<16x32xf32>
    %10 = arith.addf %7, %9 : vector<16x32xf32>
    %c0_5 = arith.constant 0 : index
    %c0_6 = arith.constant 0 : index
    %11 = vector.load %arg3[%c0_5, %c0_6] : memref<32x128xf32, #tpu.memory_space<vmem>>, vector<32x128xf32>
    %cst_7 = arith.constant dense<0.000000e+00> : vector<16x128xf32>
    %12 = tpu.matmul %10, %11, %cst_7 {dimension_numbers = #tpu.dot_dimension_numbers<[1], [0], [0], [1], [0, 0, 1, 1], [], []>} : vector<16x32xf32>, vector<32x128xf32>, vector<16x128xf32> -> vector<16x128xf32>
    %c0_8 = arith.constant 0 : index
    %c0_9 = arith.constant 0 : index
    %13 = vector.load %arg4[%c0_8, %c0_9] : memref<1x128xf32, #tpu.memory_space<vmem>>, vector<1x128xf32>
    %14 = vector.broadcast %13 : vector<1x128xf32> to vector<16x128xf32>
    %15 = arith.addf %12, %14 : vector<16x128xf32>
    %c0_10 = arith.constant 0 : index
    %c0_11 = arith.constant 0 : index
    %16 = vector.load %arg5[%c0_10, %c0_11] : memref<16x128xf32, #tpu.memory_space<vmem>>, vector<16x128xf32>
    tpu.vector_store %arg5[%c0_10, %c0_11], %15 {strides = array<i32>} : memref<16x128xf32, #tpu.memory_space<vmem>>, vector<16x128xf32>,
    return
  }
}

</mosaic_0001>

<bundles_post_ra>
// kernel: tpu_custom_call.1
= control target key start
LH: loop header
LB: loop body
LE: loop exit
PB: predicated region body
PF: predicated region fallthrough
CT: control target
= control target key end

     0   :  { %v190_v2 = vmov 0   ;;  %s300_s0 = inlined_call_operand.vmem [shape: s32[16,1], index: 0, kind: input, shape index: {}]   ;;  %s301_s1 = inlined_call_operand.vmem [shape: f32[128,32], index: 1, kind: input, shape index: {}]   ;;  %s302_s2 = inlined_call_operand.vmem [shape: f32[8,32], index: 2, kind: input, shape index: {}]   ;;  %s303_s3 = inlined_call_operand.vmem [shape: f32[32,128], index: 3, kind: input, shape index: {}]   ;;  %s304_s4 = inlined_call_operand.vmem [shape: f32[1,128], index: 4, kind: input, shape index: {}]   ;;  %s305_s5 = inlined_call_operand.hbm [shape: f32[16,128], index: 5, kind: output, shape index: {}]  }
   0x1   :  { %v23_v0 = vld [vmem:[%s300_s0] sm:$0xff]  ;;  %v52_v1 = vld [vmem:[%s301_s1 + $0x78] sm:$0xff]  ;;  %162 = vset.pattern.permute.xlu0 %v190_v2  ;;  %v51_v3 = vld [vmem:[%s301_s1 + $0x70] sm:$0xff] }
   0x2   :  { %54 = vmatpush.msra.mxu0 %v52_v1  ;;  %26 = vperm.xlu0 %162, %v23_v0   ;;  %v50_v4 = vld [vmem:[%s301_s1 + $0x68] sm:$0xff]  ;;  %v49_v5 = vld [vmem:[%s301_s1 + $0x60] sm:$0xff]  ;;  %v48_v6 = vld [vmem:[%s301_s1 + $0x58] sm:$0xff] }
   0x3   :  { %141 = vmatpush.msra.mxu2 %v52_v1 }
   0x4   :  { %55 = vmatpush.msra.mxu0 %v51_v3 }
   0x5   :  { %142 = vmatpush.msra.mxu2 %v51_v3 }
   0x6   :  { %56 = vmatpush.msra.mxu0 %v50_v4 }
   0x7   :  { %143 = vmatpush.msra.mxu2 %v50_v4 }
   0x8   :  { %10 = vsyncpa [#allocation3], 0  ;;  %v24_v7 = vld [vmem:[%s300_s0 + $0x8] sm:$0xff]  ;;  %57 = vmatpush.msra.mxu0 %v49_v5  ;;  %v47_v8 = vld [vmem:[%s301_s1 + $0x50] sm:$0xff]  ;;  %v21_v21 = vlaneseq  ;;  %v191_v24 = vmov 1.0   ;;  %vm85_vm2 = vcmask 261120  }
   0x9   :  { %144 = vmatpush.msra.mxu2 %v49_v5  ;;  %v46_v9 = vld [vmem:[%s301_s1 + $0x48] sm:$0xff]  ;;  %v45_v10 = vld [vmem:[%s301_s1 + $0x40] sm:$0xff]  ;;  %v44_v11 = vld [vmem:[%s301_s1 + $0x38] sm:$0xff]  ;;  %s193_s16 = smov 128   ;;  %s194_s17 = smov 8  }
   0xa   :  { %58 = vmatpush.msra.mxu0 %v48_v6  ;;  %29 = vperm.xlu0 %162, %v24_v7   ;;  %v43_v12 = vld [vmem:[%s301_s1 + $0x30] sm:$0xff]  ;;  %v42_v13 = vld [vmem:[%s301_s1 + $0x28] sm:$0xff]  ;;  %v41_v14 = vld [vmem:[%s301_s1 + $0x20] sm:$0xff]  ;;  %v22_v22 = vand.u32 127, %v21_v21 }
   0xb   :  { %145 = vmatpush.msra.mxu2 %v48_v6  ;;  %v40_v15 = vld [vmem:[%s301_s1 + $0x18] sm:$0xff]  ;;  %v39_v16 = vld [vmem:[%s301_s1 + $0x10] sm:$0xff]  ;;  %v38_v17 = vld [vmem:[%s301_s1 + $0x8] sm:$0xff] }
   0xc   :  { %59 = vmatpush.msra.mxu0 %v47_v8  ;;  %v37_v18 = vld [vmem:[%s301_s1] sm:$0xff]  ;;  %v80_v19 = vld [vmem:[%s303_s3 + $0x18] sm:$0xff]  ;;  %v79_v20 = vld [vmem:[%s303_s3 + $0x10] sm:$0xff] }
   0xd   :  { %146 = vmatpush.msra.mxu2 %v47_v8  ;;  %104 = vmatpush.msra.mxu1 %v80_v19  ;;  %v78_v26 = vld [vmem:[%s303_s3 + $0x8] sm:$0xff]  ;;  %v77_v27 = vld [vmem:[%s303_s3] sm:$0xff]  ;;  %s192_s3 = smov [#allocation2]  }
   0xe   :  { %60 = vmatpush.msra.mxu0 %v46_v9  ;;  %v53_v28 = vld [vmem:[%s302_s2] sm:$0xff]  ;;  %s121_s13 = sshll.u32 %s192_s3, 4  ;;  %s123_s2 = sshll.u32 %s305_s5, 4  ;;  %s122_s13 = int_to_ptr.vmem [resolvable:$true] %s121_s13  ;;  %s124_s2 = int_to_ptr.hbm [resolvable:$true] %s123_s2 }
   0xf   :  { %147 = vmatpush.msra.mxu2 %v46_v9  ;;  %105 = vmatpush.msra.mxu1 %v79_v20  ;;  %v163_v33 = vld [vmem:[%s304_s4] ss:$0 sm:$0xff] }
  0x10   :  { %61 = vmatpush.msra.mxu0 %v45_v10 }
  0x11   :  { %148 = vmatpush.msra.mxu2 %v45_v10  ;;  %106 = vmatpush.msra.mxu1 %v78_v26 }
  0x12   :  { %62 = vmatpush.msra.mxu0 %v44_v11 }
  0x13   :  { %149 = vmatpush.msra.mxu2 %v44_v11  ;;  %107 = vmatpush.msra.mxu1 %v77_v27 }
  0x14   :  { %63 = vmatpush.msra.mxu0 %v43_v12 }
  0x15   :  { %150 = vmatpush.msra.mxu2 %v43_v12 }
  0x16   :  { %64 = vmatpush.msra.mxu0 %v42_v13 }
  0x17   :  { %151 = vmatpush.msra.mxu2 %v42_v13 }
  0x18   :  { %65 = vmatpush.msra.mxu0 %v41_v14 }
  0x19   :  { %152 = vmatpush.msra.mxu2 %v41_v14 }
  0x1a   :  { %66 = vmatpush.msra.mxu0 %v40_v15 }
  0x1b   :  { %153 = vmatpush.msra.mxu2 %v40_v15 }
  0x1c   :  { %67 = vmatpush.msra.mxu0 %v39_v16 }
  0x1d   :  { %154 = vmatpush.msra.mxu2 %v39_v16 }
  0x1e   :  { %68 = vmatpush.msra.mxu0 %v38_v17 }
  0x1f   :  { %155 = vmatpush.msra.mxu2 %v38_v17 }
  0x20   :  { %69 = vmatpush.msra.mxu0 %v37_v18 }
  0x21   :  { %156 = vmatpush.msra.mxu2 %v37_v18 }
  0x74   :  { %v27_v23 = vpop.permute.xlu0 %26 }
  0x75   :  { %vm31_vm0 = vcmp.eq.s32.totalorder %v22_v22, %v27_v23 }
  0x76   :  { %137 = vmatmul.msk.f32.vlgmr.msra.gmra.mxu0 %vm31_vm0, %v191_v24 }
  0x7c   :  { %v30_v25 = vpop.permute.xlu0 %29 }
  0x7d   :  { %vm32_vm1 = vcmp.eq.s32.totalorder %v22_v22, %v30_v25 }
  0x7e   :  { %138 = vmatmul.msk.f32.vlgmr.msra.gmra.mxu2 %vm32_vm1, %v191_v24 }
  0xf3   :  { %v71_v29 = vpop.f32.mrf.mxu0 }
  0xf4   :  { %v72_v30 = vadd.f32 %v71_v29, %v53_v28 }
  0xf6   :  { %139 = vmatmul.msk.f32.vlgmr.msra.gmra.mxu1 %vm85_vm2, %v72_v30 }
 0x101   :  { %v74_v31 = vpop.f32.mrf.mxu2 }
 0x102   :  { %v75_v32 = vadd.f32 %v74_v31, %v53_v28 }
 0x104   :  { %140 = vmatmul.msk.f32.gmra.mxu1 %vm85_vm2, %v75_v32 }
 0x173   :  { %v109_v34 = vpop.f32.mrf.mxu1 }
 0x174   :  { %v110_v35 = vadd.f32 %v163_v33, %v109_v34 }
 0x176   :  { %115 = vst [vmem:[#allocation2] sm:$0xff] %v110_v35 }
 0x181   :  { %v112_v36 = vpop.f32.mrf.mxu1 }
 0x182   :  { %v113_v37 = vadd.f32 %v163_v33, %v112_v36 }
 0x184   :  { %116 = vst [vmem:[#allocation2 + $0x8] sm:$0xff] %v113_v37 }
 0x185   :  { %129 = dma.vmem_to_hbm [thread:$0]  %s122_s13, 256, %s124_s2, [#allocation3], %s193_s16, %s193_s16, %s194_s17  }
 0x186   :  { %188 = dma.done.wait [#allocation3], 256  }
 0x187   :  { %189 = vsyncadd [#allocation3], 4294967040 }
 0x188   :  { %134 = vsyncpa [#allocation3], 1 }

</bundles_post_ra>
